<compile_context>
chip_gen: v5e
topology: v5e:2x2
jax: 0.10.0
libtpu: 0.0.40
codegen_flags: <defaults>
</compile_context>

<pallas_src>
import jax
import jax.numpy as jnp
from jax.experimental import pallas as pl
from jax.experimental.pallas import tpu as pltpu


def ffn_kernel(x_ref, wu_ref, bu_ref, wd_ref, bd_ref, g_ref, b_ref, o_ref, acc_ref):
    # x_ref:  (tile_m, H)        activations (bf16 recommended), resident across k
    # wu_ref: (H, tile_k)        up-projection weight slice
    # bu_ref: (1, tile_k)        up-projection bias slice
    # wd_ref: (tile_k, H)        down-projection weight slice
    # bd_ref/g_ref/b_ref: (1, H) down bias / LN gamma / LN beta (constant across grid)
    # o_ref:  (tile_m, H)        output
    # acc_ref:(tile_m, H) f32    down-projection accumulator (scratch)
    k = pl.program_id(1)

    @pl.when(k == 0)
    def _init():
        acc_ref[...] = jnp.zeros_like(acc_ref)

    x = x_ref[...]
    tk = wu_ref.shape[1]
    n_sub = 2 if tk % 256 == 0 else 1      # sub-chunks stay lane-aligned (multiples of 128)
    sub = tk // n_sub

    # Up-projection -> bias -> ReLU -> partial down-projection per sub-chunk: the next up-matmul
    # overlaps the VPU (bias+ReLU) work of the previous one and the f32 intermediate is halved.
    # ReLU per column slice is exact since the up contraction is over H, not 4H.
    for c in range(n_sub):
        lo, hi = c * sub, (c + 1) * sub
        up = jnp.dot(x, wu_ref[:, lo:hi], preferred_element_type=jnp.float32)
        up = jnp.maximum(up + bu_ref[:, lo:hi].astype(jnp.float32), 0.0)
        acc_ref[...] += jnp.dot(up.astype(wd_ref.dtype), wd_ref[lo:hi, :],
                                preferred_element_type=jnp.float32)

    @pl.when(k == pl.num_programs(1) - 1)
    def _finalize():
        y = x.astype(jnp.float32) + acc_ref[...] + bd_ref[...].astype(jnp.float32)
        mean = jnp.mean(y, axis=-1, keepdims=True)
        d = y - mean
        var = jnp.mean(d * d, axis=-1, keepdims=True)   # two-pass: var >= 0 by construction
        normed = d * jax.lax.rsqrt(var + 1e-7)          # nn.LayerNorm(eps=1e-7)
        o_ref[...] = (normed * g_ref[...].astype(jnp.float32)
                      + b_ref[...].astype(jnp.float32)).astype(o_ref.dtype)


def _round_up(x, m):
    return ((x + m - 1) // m) * m


def _vmem_bytes(tile_m, tile_k, H, H4, act_b, w_b, resident):
    b = 2 * tile_m * H * act_b                       # x: double-buffered across i, resident across k
    b += 2 * tile_m * H * act_b                      # out: double-buffered across i
    b += tile_m * H * 4                              # f32 accumulator scratch
    wbuf = 1 if resident else 2                      # constant-index -> Buffered(1), else 2 buffers
    b += wbuf * (H * tile_k + tile_k * H) * w_b      # W_up / W_down slices
    b += wbuf * tile_k * w_b + 3 * H * w_b           # b_up slice + b_down/gamma/beta
    return b


def _vmem_capacity():
    try:
        return min(int(pltpu.get_tpu_info().vmem_capacity_bytes), 128 * 1024 * 1024)
    except Exception:
        return 64 * 1024 * 1024                      # v7x per-TensorCore size: safe lower bound


def _choose_tiles(M, H, H4, act_b, w_b, vmem_cap):
    budget = min(int(0.75 * vmem_cap), 112 * 1024 * 1024)
    m_top = min(1024, _round_up(M, 8))
    m_cands = sorted({m for m in (1024, 512, 256, 128, 64, 32, 16, 8) if m <= m_top}
                     | {m_top}, reverse=True)

    def best_m(tk, resident):
        for m in m_cands:
            if _vmem_bytes(m, tk, H, H4, act_b, w_b, resident) <= budget:
                return m
        return None

    # 1) Weight-resident: tile_k = 4H, weights hit HBM once per call. Only take it if it still
    #    leaves room for an MXU-sized M tile.
    tm = best_m(H4, True)
    if tm is not None and tm >= min(256, m_top):
        return tm, H4, True

    # 2) Streaming: maximize tile_m first (arithmetic intensity ~ tile_m), then grow tile_k.
    stream_ks = [k for k in (1024, 512, 256, 128) if k < H4 and H4 % k == 0] or [H4]
    k_min = stream_ks[-1]
    tm = best_m(k_min, False) or m_cands[-1]
    tk = next((k for k in stream_ks
               if _vmem_bytes(tm, k, H, H4, act_b, w_b, False) <= budget), k_min)
    return tm, tk, False


def feed_forward_layer(x, w_up, b_up, w_down, b_down, gamma, beta, *,
                       tile_m=None, tile_k=None, vmem_limit_bytes=None):
    B, S, H = x.shape
    M = B * S
    H4 = w_up.shape[1]
    x2 = x.reshape(M, H)

    act_b = x.dtype.itemsize
    w_b = w_up.dtype.itemsize
    vmem_cap = _vmem_capacity()

    auto_m, auto_k, _ = _choose_tiles(M, H, H4, act_b, w_b, vmem_cap)
    tile_k = auto_k if tile_k is None else min(tile_k, H4)
    tile_m = auto_m if tile_m is None else min(tile_m, _round_up(M, 8))
    resident = (tile_k == H4)

    # Ensure >=2 i tiles when M allows, so the parallel axis can shard across v7x's 2 TensorCores.
    if pl.cdiv(M, tile_m) == 1 and M >= 128:
        tile_m = _round_up(pl.cdiv(M, 2), 8)

    # Reduction tiles must divide 4H exactly (accumulator correctness); M may be ragged.
    assert H4 % tile_k == 0, "tile_k must divide 4*hidden_dim"
    assert tile_k == H4 or tile_k % 128 == 0, "tile_k must be a multiple of 128 (lane dim)"

    n_i = pl.cdiv(M, tile_m)
    grid = (n_i, H4 // tile_k)

    if vmem_limit_bytes is None:
        need = _vmem_bytes(tile_m, tile_k, H, H4, act_b, w_b, resident)
        vmem_limit_bytes = int(min(0.9 * vmem_cap,
                                   max(1.5 * need + (8 << 20), 32 << 20)))

    nbytes = lambda a: a.size * a.dtype.itemsize
    weight_passes = 1 if resident else n_i           # weights re-streamed once per i tile
    cost = pl.CostEstimate(
        flops=4 * M * H * H4,                        # two matmuls: 2*M*H*4H each
        transcendentals=M,                           # one rsqrt per row
        bytes_accessed=(nbytes(x2) + M * H * act_b   # x read + out written
                        + weight_passes * (nbytes(w_up) + nbytes(w_down) + nbytes(b_up))
                        + nbytes(b_down) + nbytes(gamma) + nbytes(beta)),
    )

    const_mode = dict(pipeline_mode=pl.Buffered(1))  # constant-index blocks: single-buffered
    w_mode = const_mode if resident else {}

    out = pl.pallas_call(
        ffn_kernel,
        out_shape=jax.ShapeDtypeStruct((M, H), x.dtype),
        grid_spec=pltpu.PrefetchScalarGridSpec(
            num_scalar_prefetch=0,
            grid=grid,
            in_specs=[
                pl.BlockSpec((tile_m, H), lambda i, k: (i, 0)),            # x rows
                pl.BlockSpec((H, tile_k), lambda i, k: (0, k), **w_mode),  # W_up column slice
                pl.BlockSpec((1, tile_k), lambda i, k: (0, k), **w_mode),  # b_up slice
                pl.BlockSpec((tile_k, H), lambda i, k: (k, 0), **w_mode),  # W_down row slice
                pl.BlockSpec((1, H), lambda i, k: (0, 0), **const_mode),   # b_down
                pl.BlockSpec((1, H), lambda i, k: (0, 0), **const_mode),   # LN gamma
                pl.BlockSpec((1, H), lambda i, k: (0, 0), **const_mode),   # LN beta
            ],
            out_specs=pl.BlockSpec((tile_m, H), lambda i, k: (i, 0)),      # lane-dense output
            scratch_shapes=[pltpu.VMEM((tile_m, H), jnp.float32)],         # f32 accumulator
        ),
        compiler_params=pltpu.CompilerParams(
            dimension_semantics=("parallel", "arbitrary"),
            vmem_limit_bytes=vmem_limit_bytes,
        ),
        cost_estimate=cost,
    )(x2, w_up, b_up, w_down, b_down, gamma, beta)
    return out.reshape(B, S, H)


if __name__ == "__main__":
    # Small-but-representative demo: hidden_dim=128 keeps the output lane-dense and exercises the
    # auto-tiling (weight-resident mode, 2 parallel M tiles). Module default hidden_dim=8 also
    # works (blocks fall back to full-extent last dims).
    B, S, H = 2, 64, 128
    H4 = 4 * H

    key = jax.random.PRNGKey(0)
    kx, k1, k2, k3, k4 = jax.random.split(key, 5)

    dt = jnp.bfloat16  # bf16 operands, f32 accumulation inside the kernel
    x = jax.random.normal(kx, (B, S, H), jnp.float32).astype(dt)

    # nn.Linear-style init, weights pre-transposed to (in, out) so the kernel does x @ W + b.
    bu = 1.0 / (H ** 0.5)
    w_up = jax.random.uniform(k1, (H, H4), jnp.float32, -bu, bu).astype(dt)
    b_up = jax.random.uniform(k2, (1, H4), jnp.float32, -bu, bu).astype(dt)
    bd = 1.0 / (H4 ** 0.5)
    w_down = jax.random.uniform(k3, (H4, H), jnp.float32, -bd, bd).astype(dt)
    b_down = jax.random.uniform(k4, (1, H), jnp.float32, -bd, bd).astype(dt)
    gamma = jnp.ones((1, H), dt)   # nn.LayerNorm default weight
    beta = jnp.zeros((1, H), dt)   # nn.LayerNorm default bias

    out = feed_forward_layer(x, w_up, b_up, w_down, b_down, gamma, beta)
    jax.block_until_ready(out)

    # Pure-JAX f32 reference on the same bf16-quantized parameter/activation values.
    xf = x.astype(jnp.float32).reshape(-1, H)
    up = jnp.maximum(xf @ w_up.astype(jnp.float32) + b_up.astype(jnp.float32), 0.0)
    down = up @ w_down.astype(jnp.float32) + b_down.astype(jnp.float32)
    y = xf + down
    mean = y.mean(-1, keepdims=True)
    var = ((y - mean) ** 2).mean(-1, keepdims=True)
    ref = ((y - mean) / jnp.sqrt(var + 1e-7)) * gamma.astype(jnp.float32) \
          + beta.astype(jnp.float32)

    err = jnp.max(jnp.abs(out.reshape(-1, H).astype(jnp.float32) - ref))
    assert err < 5e-2, f"kernel/reference mismatch, max abs err = {err}"

    print("KERNEL_OK")
</pallas_src>

<mosaic_0001>
module attributes {stable_mosaic.version = 11 : i64} {
  func.func @ffn_kernel(%arg0: i32, %arg1: i32, %arg2: memref<64x128xbf16, #tpu.memory_space<vmem>>, %arg3: memref<128x512xbf16, #tpu.memory_space<vmem>>, %arg4: memref<1x512xbf16, #tpu.memory_space<vmem>>, %arg5: memref<512x128xbf16, #tpu.memory_space<vmem>>, %arg6: memref<1x128xbf16, #tpu.memory_space<vmem>>, %arg7: memref<1x128xbf16, #tpu.memory_space<vmem>>, %arg8: memref<1x128xbf16, #tpu.memory_space<vmem>>, %arg9: memref<64x128xbf16, #tpu.memory_space<vmem>>, %arg10: memref<64x128xf32, #tpu.memory_space<vmem>>) attributes {dimension_semantics = [#tpu.dimension_semantics<parallel>, #tpu.dimension_semantics<arbitrary>], iteration_bounds = array<i64: 2, 1>, scalar_prefetch = 0 : i64, scratch_operands = 1 : i64, tpu.core_type = #tpu.core_type<tc>, window_params = [{transform_indices = @transform_0, window_bounds = array<i64: 64, 128>}, {pipeline_mode = #tpu.pipeline_mode<synchronous>, transform_indices = @transform_1, window_bounds = array<i64: 128, 512>}, {pipeline_mode = #tpu.pipeline_mode<synchronous>, transform_indices = @transform_2, window_bounds = array<i64: 1, 512>}, {pipeline_mode = #tpu.pipeline_mode<synchronous>, transform_indices = @transform_3, window_bounds = array<i64: 512, 128>}, {pipeline_mode = #tpu.pipeline_mode<synchronous>, transform_indices = @transform_4, window_bounds = array<i64: 1, 128>}, {pipeline_mode = #tpu.pipeline_mode<synchronous>, transform_indices = @transform_5, window_bounds = array<i64: 1, 128>}, {pipeline_mode = #tpu.pipeline_mode<synchronous>, transform_indices = @transform_6, window_bounds = array<i64: 1, 128>}, {transform_indices = @transform_7, window_bounds = array<i64: 64, 128>}]} {
    %c0_i32 = arith.constant 0 : i32
    %0 = arith.cmpi eq, %arg1, %c0_i32 : i32
    %1 = arith.extui %0 : i1 to i32
    %c0_i32_0 = arith.constant 0 : i32
    %2 = arith.cmpi ne, %1, %c0_i32_0 : i32
    scf.if %2 {
      %cst_28 = arith.constant 0.000000e+00 : f32
      %35 = vector.broadcast %cst_28 : f32 to vector<64x128xf32>
      %c0_29 = arith.constant 0 : index
      %c0_30 = arith.constant 0 : index
      %36 = vector.load %arg10[%c0_29, %c0_30] : memref<64x128xf32, #tpu.memory_space<vmem>>, vector<64x128xf32>
      tpu.vector_store %arg10[%c0_29, %c0_30], %35 {strides = array<i32>} : memref<64x128xf32, #tpu.memory_space<vmem>>, vector<64x128xf32>,
    } else {
    }
    %c0 = arith.constant 0 : index
    %c0_1 = arith.constant 0 : index
    %3 = vector.load %arg2[%c0, %c0_1] : memref<64x128xbf16, #tpu.memory_space<vmem>>, vector<64x128xbf16>
    %c0_2 = arith.constant 0 : index
    %c0_3 = arith.constant 0 : index
    %4 = vector.load %arg3[%c0_2, %c0_3] : memref<128x512xbf16, #tpu.memory_space<vmem>>, vector<128x256xbf16>
    %cst = arith.constant dense<0.000000e+00> : vector<64x256xf32>
    %5 = tpu.matmul %3, %4, %cst {dimension_numbers = #tpu.dot_dimension_numbers<[1], [0], [0], [1], [0, 0, 1, 1], [], []>} : vector<64x128xbf16>, vector<128x256xbf16>, vector<64x256xf32> -> vector<64x256xf32>
    %c0_4 = arith.constant 0 : index
    %c0_5 = arith.constant 0 : index
    %6 = vector.load %arg4[%c0_4, %c0_5] : memref<1x512xbf16, #tpu.memory_space<vmem>>, vector<1x256xbf16>
    %7 = arith.extf %6 : vector<1x256xbf16> to vector<1x256xf32>
    %8 = vector.broadcast %7 : vector<1x256xf32> to vector<64x256xf32>
    %9 = arith.addf %5, %8 : vector<64x256xf32>
    %cst_6 = arith.constant 0.000000e+00 : f32
    %10 = vector.broadcast %cst_6 : f32 to vector<64x256xf32>
    %11 = arith.maximumf %9, %10 : vector<64x256xf32>
    %c0_7 = arith.constant 0 : index
    %c0_8 = arith.constant 0 : index
    %12 = vector.load %arg10[%c0_7, %c0_8] : memref<64x128xf32, #tpu.memory_space<vmem>>, vector<64x128xf32>
    %13 = arith.truncf %11 : vector<64x256xf32> to vector<64x256xbf16>
    %c0_9 = arith.constant 0 : index
    %c0_10 = arith.constant 0 : index
    %14 = vector.load %arg5[%c0_9, %c0_10] : memref<512x128xbf16, #tpu.memory_space<vmem>>, vector<256x128xbf16>
    %cst_11 = arith.constant dense<0.000000e+00> : vector<64x128xf32>
    %15 = tpu.matmul %13, %14, %cst_11 {dimension_numbers = #tpu.dot_dimension_numbers<[1], [0], [0], [1], [0, 0, 1, 1], [], []>} : vector<64x256xbf16>, vector<256x128xbf16>, vector<64x128xf32> -> vector<64x128xf32>
    %16 = arith.addf %12, %15 : vector<64x128xf32>
    %c0_12 = arith.constant 0 : index
    %c0_13 = arith.constant 0 : index
    %17 = vector.load %arg10[%c0_12, %c0_13] : memref<64x128xf32, #tpu.memory_space<vmem>>, vector<64x128xf32>
    tpu.vector_store %arg10[%c0_12, %c0_13], %16 {strides = array<i32>} : memref<64x128xf32, #tpu.memory_space<vmem>>, vector<64x128xf32>,
    %c0_14 = arith.constant 0 : index
    %c256 = arith.constant 256 : index
    %18 = vector.load %arg3[%c0_14, %c256] : memref<128x512xbf16, #tpu.memory_space<vmem>>, vector<128x256xbf16>
    %cst_15 = arith.constant dense<0.000000e+00> : vector<64x256xf32>
    %19 = tpu.matmul %3, %18, %cst_15 {dimension_numbers = #tpu.dot_dimension_numbers<[1], [0], [0], [1], [0, 0, 1, 1], [], []>} : vector<64x128xbf16>, vector<128x256xbf16>, vector<64x256xf32> -> vector<64x256xf32>
    %c0_16 = arith.constant 0 : index
    %c256_17 = arith.constant 256 : index
    %20 = vector.load %arg4[%c0_16, %c256_17] : memref<1x512xbf16, #tpu.memory_space<vmem>>, vector<1x256xbf16>
    %21 = arith.extf %20 : vector<1x256xbf16> to vector<1x256xf32>
    %22 = vector.broadcast %21 : vector<1x256xf32> to vector<64x256xf32>
    %23 = arith.addf %19, %22 : vector<64x256xf32>
    %cst_18 = arith.constant 0.000000e+00 : f32
    %24 = vector.broadcast %cst_18 : f32 to vector<64x256xf32>
    %25 = arith.maximumf %23, %24 : vector<64x256xf32>
    %c0_19 = arith.constant 0 : index
    %c0_20 = arith.constant 0 : index
    %26 = vector.load %arg10[%c0_19, %c0_20] : memref<64x128xf32, #tpu.memory_space<vmem>>, vector<64x128xf32>
    %27 = arith.truncf %25 : vector<64x256xf32> to vector<64x256xbf16>
    %c256_21 = arith.constant 256 : index
    %c0_22 = arith.constant 0 : index
    %28 = vector.load %arg5[%c256_21, %c0_22] : memref<512x128xbf16, #tpu.memory_space<vmem>>, vector<256x128xbf16>
    %cst_23 = arith.constant dense<0.000000e+00> : vector<64x128xf32>
    %29 = tpu.matmul %27, %28, %cst_23 {dimension_numbers = #tpu.dot_dimension_numbers<[1], [0], [0], [1], [0, 0, 1, 1], [], []>} : vector<64x256xbf16>, vector<256x128xbf16>, vector<64x128xf32> -> vector<64x128xf32>
    %30 = arith.addf %26, %29 : vector<64x128xf32>
    %c0_24 = arith.constant 0 : index
    %c0_25 = arith.constant 0 : index
    %31 = vector.load %arg10[%c0_24, %c0_25] : memref<64x128xf32, #tpu.memory_space<vmem>>, vector<64x128xf32>
    tpu.vector_store %arg10[%c0_24, %c0_25], %30 {strides = array<i32>} : memref<64x128xf32, #tpu.memory_space<vmem>>, vector<64x128xf32>,
    %c0_i32_26 = arith.constant 0 : i32
    %32 = arith.cmpi eq, %arg1, %c0_i32_26 : i32
    %33 = arith.extui %32 : i1 to i32
    %c0_i32_27 = arith.constant 0 : i32
    %34 = arith.cmpi ne, %33, %c0_i32_27 : i32
    scf.if %34 {
      %35 = arith.extf %3 : vector<64x128xbf16> to vector<64x128xf32>
      %c0_28 = arith.constant 0 : index
      %c0_29 = arith.constant 0 : index
      %36 = vector.load %arg10[%c0_28, %c0_29] : memref<64x128xf32, #tpu.memory_space<vmem>>, vector<64x128xf32>
      %37 = arith.addf %35, %36 : vector<64x128xf32>
      %c0_30 = arith.constant 0 : index
      %c0_31 = arith.constant 0 : index
      %38 = vector.load %arg6[%c0_30, %c0_31] : memref<1x128xbf16, #tpu.memory_space<vmem>>, vector<1x128xbf16>
      %39 = arith.extf %38 : vector<1x128xbf16> to vector<1x128xf32>
      %40 = vector.broadcast %39 : vector<1x128xf32> to vector<64x128xf32>
      %41 = arith.addf %37, %40 : vector<64x128xf32>
      %cst_32 = arith.constant dense<0.000000e+00> : vector<64xf32>
      %42 = vector.multi_reduction <add>, %41, %cst_32 [1] : vector<64x128xf32> to vector<64xf32>
      %43 = vector.shape_cast %42 : vector<64xf32> to vector<64x1xf32>
      %cst_33 = arith.constant 1.280000e+02 : f32
      %44 = vector.broadcast %cst_33 : f32 to vector<64x1xf32>
      %45 = arith.divf %43, %44 : vector<64x1xf32>
      %46 = vector.broadcast %45 : vector<64x1xf32> to vector<64x128xf32>
      %47 = arith.subf %41, %46 : vector<64x128xf32>
      %48 = arith.mulf %47, %47 : vector<64x128xf32>
      %cst_34 = arith.constant dense<0.000000e+00> : vector<64xf32>
      %49 = vector.multi_reduction <add>, %48, %cst_34 [1] : vector<64x128xf32> to vector<64xf32>
      %50 = vector.shape_cast %49 : vector<64xf32> to vector<64x1xf32>
      %cst_35 = arith.constant 1.280000e+02 : f32
      %51 = vector.broadcast %cst_35 : f32 to vector<64x1xf32>
      %52 = arith.divf %50, %51 : vector<64x1xf32>
      %cst_36 = arith.constant 1.000000e-07 : f32
      %53 = vector.broadcast %cst_36 : f32 to vector<64x1xf32>
      %54 = arith.addf %52, %53 : vector<64x1xf32>
      %55 = math.rsqrt %54 : vector<64x1xf32>
      %56 = vector.broadcast %55 : vector<64x1xf32> to vector<64x128xf32>
      %57 = arith.mulf %47, %56 : vector<64x128xf32>
      %c0_37 = arith.constant 0 : index
      %c0_38 = arith.constant 0 : index
      %58 = vector.load %arg7[%c0_37, %c0_38] : memref<1x128xbf16, #tpu.memory_space<vmem>>, vector<1x128xbf16>
      %59 = arith.extf %58 : vector<1x128xbf16> to vector<1x128xf32>
      %60 = vector.broadcast %59 : vector<1x128xf32> to vector<64x128xf32>
      %61 = arith.mulf %57, %60 : vector<64x128xf32>
      %c0_39 = arith.constant 0 : index
      %c0_40 = arith.constant 0 : index
      %62 = vector.load %arg8[%c0_39, %c0_40] : memref<1x128xbf16, #tpu.memory_space<vmem>>, vector<1x128xbf16>
      %63 = arith.extf %62 : vector<1x128xbf16> to vector<1x128xf32>
      %64 = vector.broadcast %63 : vector<1x128xf32> to vector<64x128xf32>
      %65 = arith.addf %61, %64 : vector<64x128xf32>
      %66 = arith.truncf %65 : vector<64x128xf32> to vector<64x128xbf16>
      %c0_41 = arith.constant 0 : index
      %c0_42 = arith.constant 0 : index
      %67 = vector.load %arg9[%c0_41, %c0_42] : memref<64x128xbf16, #tpu.memory_space<vmem>>, vector<64x128xbf16>
      tpu.vector_store %arg9[%c0_41, %c0_42], %66 {strides = array<i32>} : memref<64x128xbf16, #tpu.memory_space<vmem>>, vector<64x128xbf16>,
    } else {
    }
    return
  }
  func.func @transform_0(%arg0: i32, %arg1: i32) -> (i32, i32) {
    %c0_i32 = arith.constant 0 : i32
    %c0_i32_0 = arith.constant 0 : i32
    return %arg0, %c0_i32 : i32, i32
  }
  func.func @transform_1(%arg0: i32, %arg1: i32) -> (i32, i32) {
    %c0_i32 = arith.constant 0 : i32
    %c0_i32_0 = arith.constant 0 : i32
    return %c0_i32, %arg1 : i32, i32
  }
  func.func @transform_2(%arg0: i32, %arg1: i32) -> (i32, i32) {
    %c0_i32 = arith.constant 0 : i32
    %c0_i32_0 = arith.constant 0 : i32
    return %c0_i32, %arg1 : i32, i32
  }
  func.func @transform_3(%arg0: i32, %arg1: i32) -> (i32, i32) {
    %c0_i32 = arith.constant 0 : i32
    %c0_i32_0 = arith.constant 0 : i32
    return %arg1, %c0_i32 : i32, i32
  }
  func.func @transform_4(%arg0: i32, %arg1: i32) -> (i32, i32) {
    %c0_i32 = arith.constant 0 : i32
    %c0_i32_0 = arith.constant 0 : i32
    %c0_i32_1 = arith.constant 0 : i32
    return %c0_i32, %c0_i32_0 : i32, i32
  }
  func.func @transform_5(%arg0: i32, %arg1: i32) -> (i32, i32) {
    %c0_i32 = arith.constant 0 : i32
    %c0_i32_0 = arith.constant 0 : i32
    %c0_i32_1 = arith.constant 0 : i32
    return %c0_i32, %c0_i32_0 : i32, i32
  }
  func.func @transform_6(%arg0: i32, %arg1: i32) -> (i32, i32) {
    %c0_i32 = arith.constant 0 : i32
    %c0_i32_0 = arith.constant 0 : i32
    %c0_i32_1 = arith.constant 0 : i32
    return %c0_i32, %c0_i32_0 : i32, i32
  }
  func.func @transform_7(%arg0: i32, %arg1: i32) -> (i32, i32) {
    %c0_i32 = arith.constant 0 : i32
    %c0_i32_0 = arith.constant 0 : i32
    return %arg0, %c0_i32 : i32, i32
  }
}

</mosaic_0001>

<bundles_post_ra>
// kernel: tpu_custom_call.1
= control target key start
LH: loop header
LB: loop body
LE: loop exit
PB: predicated region body
PF: predicated region fallthrough
CT: control target
= control target key end

     0   :  { %s2695_s0 = inlined_call_operand.hbm [shape: bf16[128,128], index: 0, kind: input, shape index: {}]   ;;  %s2696_s1 = inlined_call_operand.hbm [shape: bf16[128,512], index: 1, kind: input, shape index: {}]   ;;  %s2697_s2 = inlined_call_operand.hbm [shape: bf16[1,512], index: 2, kind: input, shape index: {}]   ;;  %s2698_s3 = inlined_call_operand.hbm [shape: bf16[512,128], index: 3, kind: input, shape index: {}]   ;;  %s2699_s4 = inlined_call_operand.vmem [shape: bf16[1,128], index: 4, kind: input, shape index: {}]   ;;  %s2700_s5 = inlined_call_operand.vmem [shape: bf16[1,128], index: 5, kind: input, shape index: {}]   ;;  %s2701_s6 = inlined_call_operand.vmem [shape: bf16[1,128], index: 6, kind: input, shape index: {}]   ;;  %s2702_s7 = inlined_call_operand.hbm [shape: bf16[128,128], index: 7, kind: output, shape index: {}]  }
   0x1   :  { %2707 = sst [smem:[#allocation18_spill]] %s2696_s1 }
   0x2   :  { %2708 = sst [smem:[#allocation19_spill]] %s2697_s2 }
   0x3   :  { %2709 = sst [smem:[#allocation20_spill]] %s2698_s3 }
   0x4   :  { %12 = vsyncpa [#allocation4], 0 }
   0x5   :  { %14 = vsyncpa [#allocation4 + $0x1], 0 }
   0x6   :  { %15 = vsyncpa [#allocation7], 0 }
   0x7   :  { %16 = vsyncpa [#allocation10], 0 }
   0x8   :  { %17 = vsyncpa [#allocation5], 0 }
   0x9   :  { %19 = vsyncpa [#allocation5 + $0x1], 0  ;;  %s2366_s24 = smov 0   ;;  %s2368_s25 = smov 0  }
   0xa   :  { %s2370_s26 = smov 0   ;;  %s2372_s27 = smov 0  }
   0xb   :  { %s2374_s28 = smov 0   ;;  %s2376_s29 = smov 0  }
   0xc LB: > { %s1600_s30 = sadd.s32 4294967295, %s2314_s29   ;;  %s1601_s8 = sadd.s32 4294967294, %s2314_s29   ;;  %s2314_s29 = sphi %s2376_s29, %s25_s29   ;;  %s2310_s28 = sphi %s2374_s28, %s2731_s28   ;;  %s2306_s27 = sphi %s2372_s27, %s2730_s27   ;;  %s2302_s26 = sphi %s2370_s26, %s2729_s26   ;;  %s2298_s25 = sphi %s2368_s25, %s2728_s25   ;;  %s2294_s24 = sphi %s2366_s24, %s2727_s24  }
   0xd   : > { %p57_p0 = scmp.ne.s32.totalorder %s2298_s25, %s2294_s24  ;;  %p2400_p1 = scmp.eq.s32.totalorder %s1600_s30, 0 }
   0xe   : > { %p2404_p2 = scmp.eq.s32.totalorder %s1600_s30, 1  ;;  %p228_p3 = scmp.eq.s32.totalorder %s1601_s8, 1 }
   0xf   : > { %p2410_p4 = por %p2400_p1, %p57_p0  ;;  %p1602_p5 = scmp.ge.s32.totalorder %s2314_s29, 1 }
  0x10   : > { %p2415_p6 = por %p228_p3, %p57_p0  ;;  %p235_p7 = scmp.lt.s32.totalorder %s2314_s29, 3 }
  0x11   : > { %s2715_s1 = sld [smem:[#allocation18_spill]]  ;;  %s2316_s17 = smov [#allocation6]  }
  0x12   : > { %s2713_s12 = scalar_select %p2415_p6, 1, 0 }
  0x13   : > { %p2423_p8 = pnand %p1602_p5, %p235_p7  ;;  %s251_s18 = sshll.u32 %s2316_s17, 4  ;;  %s252_s18 = int_to_ptr.vmem [resolvable:$true] %s251_s18 }
  0x14   : > { %2714 = sst [smem:[#allocation16_spill]] %s2713_s12  ;;  %p1606_p11 = scmp.ge.s32.totalorder %s2314_s29, 2 }
  0x15   : > { %p2002_p9 = pneg %p2423_p8  ;;  %s2718_s2 = sld [smem:[#allocation19_spill]] }
  0x16   : > { %s2317_s23 = smov 256   ;;  %s2318_s30 = smov 16  }
  0x17   : > { %s249_s15 = sshll.u32 %s2715_s1, 4  ;;  %p2431_p10 = pnand %p2002_p9, %p2400_p1  ;;  %s250_s15 = int_to_ptr.hbm [resolvable:$true] %s249_s15 }
  0x18   : > { %s2319_s8 = smov [#allocation8]   ;;  %s2719_s3 = sld [smem:[#allocation20_spill]] }
  0x19   : > { %2005 = dma.hbm_to_vmem [thread:$0]  (!%p2431_p10), %s250_s15, 4096, %s252_s18, [#allocation7], %s2317_s23, %s2317_s23, %s2318_s30  }
  0x1a   : > { %s268_s13 = sshll.u32 %s2319_s8, 4  ;;  %s2320_s20 = smov [#allocation9]   ;;  %s269_s13 = int_to_ptr.vmem [resolvable:$true] %s268_s13 }
  0x1b   : > { %s266_s22 = sshll.u32 %s2718_s2, 4  ;;  %s282_s21 = sshll.u32 %s2320_s20, 4  ;;  %s267_s22 = int_to_ptr.hbm [resolvable:$true] %s266_s22  ;;  %s283_s21 = int_to_ptr.vmem [resolvable:$true] %s282_s21 }
  0x1c   : > { %2008 = dma.hbm_to_vmem [thread:$0]  (!%p2431_p10), %s267_s22, 64, %s269_s13, [#allocation7]  }
  0x1d   : > { %s2703_s2 = smov 64   ;;  %s2704_s15 = smov 4  }
  0x1e   : > { %s280_s1 = sshll.u32 %s2719_s3, 4  ;;  %s44_s18 = sadd.s32 1, %s2302_s26  ;;  %s281_s1 = int_to_ptr.hbm [resolvable:$true] %s280_s1 }
  0x1f   : > { %2011 = dma.hbm_to_vmem [thread:$0]  (!%p2431_p10), %s281_s1, 4096, %s283_s21, [#allocation10], %s2703_s2, %s2703_s2, %s2704_s15  }
  0x20   : > { %s37_s23 = sadd.s32 1, %s2310_s28  ;;  %p51_p12 = scmp.ne.s32.totalorder %s2302_s26, %s2298_s25 }
  0x21   : > { %p39_p13 = scmp.ge.s32.totalorder %s37_s23, 2  ;;  %p52_p0 = scmp.eq.s32.totalorder %s2314_s29, 0 }
  0x22   : > { %p2458_p3 = por %p2404_p2, %p51_p12  ;;  %p2023_p5 = scmp.lt.s32.totalorder %s2314_s29, 2 }
  0x23   : > { %s2733_s23 = smov (%p39_p13, %s37_s23), 0  ;;  %p2465_p7 = por %p52_p0, %p51_p12 }
  0x24   : > { %2721 = sst [smem:[#allocation17_spill]] %s2733_s23  ;;  %s305_s1 = sand.u32 1, %s2302_s26  }
  0x25   : > { %s41_s30 = ssub.s32 %s2310_s28, %s2733_s23  ;;  %s1607_s8 = sshll.u32 %s305_s1, 5 }
  0x26   : > { %p42_p9 = scmp.eq.s32.totalorder %s41_s30, 0  ;;  %s1893_s13 = sshll.u32 %s2310_s28, 5 }
  0x27   : > { %s314_s20 = scalar_lea.hbm %s2695_s0, %s1893_s13  ;;  %s309_s21 = scalar_lea.vmem [#allocation3], %s1607_s8 }
  0x28   : > { %s2474_s10 = scalar_select %p42_p9, %s2302_s26, %s44_s18  }
  0x29   : > { %s317_s2 = sshll.u32 %s309_s21, 4  ;;  %s315_s15 = sshll.u32 %s314_s20, 4  ;;  %s318_s2 = int_to_ptr.vmem [resolvable:$true] %s317_s2  ;;  %s316_s15 = int_to_ptr.hbm [resolvable:$true] %s315_s15 }
  0x2a   : > { %p2013_p2 = pnand %p2023_p5, %p2465_p7  ;;  %s306_s3 = scalar_lea.sflag [#allocation4], %s305_s1 }
  0x2b   : > { %s2723_s12 = smov 4   ;;  %s2724_s23 = smov 64  }
  0x2c   : > { %2015 = dma.hbm_to_vmem [thread:$0]  (!%p2013_p2), %s316_s15, 512, %s318_s2, %s306_s3, %s2724_s23, %s2724_s23, %s2723_s12  }
  0x2d   : > { %329 = sbr.rel (%p2423_p8) target bundleno = 762 (0x2fa), region = 48  ;;  %s2489_s18 = sand.u32 (!%p2423_p8), 1, %s2298_s25  }
  0x2e   : > { %s1611_s30 = sshll.u32 (!%p2423_p8), %s2489_s18, 5  ;;  %s332_s8 = scalar_lea.sflag (!%p2423_p8), [#allocation4], %s2489_s18 }
  0x2f   : > { %s2495_s19 = scalar_lea.vmem (!%p2423_p8), [#allocation3], %s1611_s30 }
  0x32   : > { %2277 = dma.done.wait (%p2410_p4), %s332_s8, 512  }
  0x33   : > { %2279 = vsyncadd (%p2410_p4), %s332_s8, 4294966784 }
  0x34   : > { %2281 = dma.done.wait (%p2400_p1), [#allocation7], 4160  }
  0x35   : > { %2283 = vsyncadd (%p2400_p1), [#allocation7], 4294963136 }
  0x36   : > { %2285 = dma.done.wait (%p2400_p1), [#allocation10], 4096  }
  0x37   : > { %2287 = vsyncadd (%p2400_p1), [#allocation10], 4294963200  ;;  %v1690_v0 = vld [vmem:[#allocation6 + $0xe0] sm:$0xf]  ;;  %v1913_v1 = vld [vmem:[#allocation6 + $0xec] sm:$0xf0] }
  0x38   : > { %v1912_v2 = vld [vmem:[#allocation6 + $0xe4] sm:$0xf]  ;;  %v1691_v3 = vor.u32 %v1913_v1, %v1690_v0  ;;  %v1692_v4 = vld [vmem:[#allocation6 + $0xf0] sm:$0xf0]  ;;  %v1682_v5 = vld [vmem:[#allocation6 + $0xc0] sm:$0xf] }
  0x39   : > { %v1911_v6 = vld [vmem:[#allocation6 + $0xcc] sm:$0xf0]  ;;  %v1695_v7 = vor.u32 %v1912_v2, %v1692_v4  ;;  %v1910_v8 = vld [vmem:[#allocation6 + $0xc4] sm:$0xf]  ;;  %v1684_v9 = vld [vmem:[#allocation6 + $0xd0] sm:$0xf0] }
  0x3a   : > { %536 = vmatpush.bf16.msra.mxu0 %v1691_v3  ;;  %v1683_v10 = vor.u32 %v1911_v6, %v1682_v5  ;;  %v1687_v11 = vor.u32 %v1910_v8, %v1684_v9  ;;  %v1674_v12 = vld [vmem:[#allocation6 + $0xa0] sm:$0xf]  ;;  %v1909_v13 = vld [vmem:[#allocation6 + $0xac] sm:$0xf0]  ;;  %v1908_v14 = vld [vmem:[#allocation6 + $0xa4] sm:$0xf] }
  0x3b   : > { %565 = vmatpush.bf16.msra.mxu1 %v1695_v7  ;;  %v1676_v15 = vld [vmem:[#allocation6 + $0xb0] sm:$0xf0]  ;;  %v1675_v16 = vor.u32 %v1909_v13, %v1674_v12  ;;  %v1666_v18 = vld [vmem:[#allocation6 + $0x80] sm:$0xf]  ;;  %v1907_v19 = vld [vmem:[#allocation6 + $0x8c] sm:$0xf0] }
  0x3c   : > { %v1679_v17 = vor.u32 %v1908_v14, %v1676_v15  ;;  %v1906_v20 = vld [vmem:[#allocation6 + $0x84] sm:$0xf]  ;;  %v1668_v21 = vld [vmem:[#allocation6 + $0x90] sm:$0xf0]  ;;  %v1667_v22 = vor.u32 %v1907_v19, %v1666_v18  ;;  %v1658_v24 = vld [vmem:[#allocation6 + $0x60] sm:$0xf] }
  0x3d   : > { %v1671_v23 = vor.u32 %v1906_v20, %v1668_v21  ;;  %v1905_v25 = vld [vmem:[#allocation6 + $0x6c] sm:$0xf0]  ;;  %v1904_v26 = vld [vmem:[#allocation6 + $0x64] sm:$0xf]  ;;  %v1660_v27 = vld [vmem:[#allocation6 + $0x70] sm:$0xf0] }
  0x3e   : > { %537 = vmatpush.bf16.msra.mxu0 %v1683_v10  ;;  %v1659_v28 = vor.u32 %v1905_v25, %v1658_v24  ;;  %v1663_v29 = vor.u32 %v1904_v26, %v1660_v27  ;;  %v1650_v30 = vld [vmem:[#allocation6 + $0x40] sm:$0xf]  ;;  %v1903_v31 = vld [vmem:[#allocation6 + $0x4c] sm:$0xf0]  ;;  %v1902_v32 = vld [vmem:[#allocation6 + $0x44] sm:$0xf] }
  0x3f   : > { %566 = vmatpush.bf16.msra.mxu1 %v1687_v11  ;;  %v1652_v33 = vld [vmem:[#allocation6 + $0x50] sm:$0xf0]  ;;  %v1651_v34 = vor.u32 %v1903_v31, %v1650_v30  ;;  %v1642_v36 = vld [vmem:[#allocation6 + $0x20] sm:$0xf]  ;;  %v1901_v37 = vld [vmem:[#allocation6 + $0x2c] sm:$0xf0] }
  0x40   : > { %v1655_v35 = vor.u32 %v1902_v32, %v1652_v33  ;;  %v1900_v38 = vld [vmem:[#allocation6 + $0x24] sm:$0xf]  ;;  %v1644_v39 = vld [vmem:[#allocation6 + $0x30] sm:$0xf0]  ;;  %v1643_v40 = vor.u32 %v1901_v37, %v1642_v36  ;;  %v1634_v42 = vld [vmem:[#allocation6] sm:$0xf] }
  0x41   : > { %v1647_v41 = vor.u32 %v1900_v38, %v1644_v39  ;;  %v1899_v43 = vld [vmem:[#allocation6 + $0xc] sm:$0xf0]  ;;  %v1898_v44 = vld [vmem:[#allocation6 + $0x4] sm:$0xf]  ;;  %v1636_v45 = vld [vmem:[#allocation6 + $0x10] sm:$0xf0] }
  0x42   : > { %538 = vmatpush.bf16.msra.mxu0 %v1675_v16  ;;  %v1818_v46 = vld [vmem:[#allocation6 + $0xe8] sm:$0xf]  ;;  %v1945_v47 = vld [vmem:[#allocation6 + $0xf4] sm:$0xf0]  ;;  %v1944_v48 = vld [vmem:[#allocation6 + $0xec] sm:$0xf]  ;;  %v1635_v50 = vor.u32 %v1899_v43, %v1634_v42  ;;  %v1639_v51 = vor.u32 %v1898_v44, %v1636_v45 }
  0x43   : > { %567 = vmatpush.bf16.msra.mxu1 %v1679_v17  ;;  %v1820_v49 = vld [vmem:[#allocation6 + $0xf8] sm:$0xf0]  ;;  %v1819_v52 = vor.u32 %v1945_v47, %v1818_v46  ;;  %v1810_v54 = vld [vmem:[#allocation6 + $0xc8] sm:$0xf]  ;;  %v1943_v55 = vld [vmem:[#allocation6 + $0xd4] sm:$0xf0] }
  0x44   : > { %v1823_v53 = vor.u32 %v1944_v48, %v1820_v49  ;;  %v2510_v56 = vld [vmem:[%s2495_s19] sm:$0xff]  ;;  %v1942_v57 = vld [vmem:[#allocation6 + $0xcc] sm:$0xf]  ;;  %v1812_v58 = vld [vmem:[#allocation6 + $0xd8] sm:$0xf0]  ;;  %v1811_v59 = vor.u32 %v1943_v55, %v1810_v54  ;;  %s2629_s15 = scalar_lea.vmem [#allocation11], %s1611_s30 }
  0x45   : > { %v1815_v60 = vor.u32 %v1942_v57, %v1812_v58  ;;  %v1802_v61 = vld [vmem:[#allocation6 + $0xa8] sm:$0xf]  ;;  %v1941_v62 = vld [vmem:[#allocation6 + $0xb4] sm:$0xf0]  ;;  %v1940_v63 = vld [vmem:[#allocation6 + $0xac] sm:$0xf] }
  0x46   : > { %539 = vmatpush.bf16.msra.mxu0 %v1667_v22  ;;  %v1804_v0 = vld [vmem:[#allocation6 + $0xb8] sm:$0xf0]  ;;  %v1803_v1 = vor.u32 %v1941_v62, %v1802_v61  ;;  %v1794_v3 = vld [vmem:[#allocation6 + $0x88] sm:$0xf]  ;;  %v1939_v4 = vld [vmem:[#allocation6 + $0x94] sm:$0xf0] }
  0x47   : > { %568 = vmatpush.bf16.msra.mxu1 %v1671_v23  ;;  %v1807_v2 = vor.u32 %v1940_v63, %v1804_v0  ;;  %v1938_v5 = vld [vmem:[#allocation6 + $0x8c] sm:$0xf]  ;;  %v1796_v6 = vld [vmem:[#allocation6 + $0x98] sm:$0xf0]  ;;  %v1795_v7 = vor.u32 %v1939_v4, %v1794_v3  ;;  %v1786_v9 = vld [vmem:[#allocation6 + $0x68] sm:$0xf] }
  0x48   : > { %v1799_v8 = vor.u32 %v1938_v5, %v1796_v6  ;;  %v1937_v10 = vld [vmem:[#allocation6 + $0x74] sm:$0xf0]  ;;  %v1936_v11 = vld [vmem:[#allocation6 + $0x6c] sm:$0xf]  ;;  %v1788_v12 = vld [vmem:[#allocation6 + $0x78] sm:$0xf0] }
  0x49   : > { %v1787_v13 = vor.u32 %v1937_v10, %v1786_v9  ;;  %v1791_v14 = vor.u32 %v1936_v11, %v1788_v12  ;;  %v1778_v15 = vld [vmem:[#allocation6 + $0x48] sm:$0xf]  ;;  %v1935_v16 = vld [vmem:[#allocation6 + $0x54] sm:$0xf0]  ;;  %v1934_v18 = vld [vmem:[#allocation6 + $0x4c] sm:$0xf] }
  0x4a   : > { %540 = vmatpush.bf16.msra.mxu0 %v1659_v28  ;;  %v1895_v17 = vld [vmem:[%s2495_s19 + $0x8] sm:$0xff]  ;;  %v1780_v19 = vld [vmem:[#allocation6 + $0x58] sm:$0xf0]  ;;  %v1779_v20 = vor.u32 %v1935_v16, %v1778_v15  ;;  %v1933_v23 = vld [vmem:[#allocation6 + $0x34] sm:$0xf0]  ;;  %s1962_s23 = sshll.u32 %s2306_s27, 5 }
  0x4b   : > { %569 = vmatpush.bf16.msra.mxu1 %v1663_v29  ;;  %v1783_v21 = vor.u32 %v1934_v18, %v1780_v19  ;;  %v1770_v22 = vld [vmem:[#allocation6 + $0x28] sm:$0xf]  ;;  %v1932_v24 = vld [vmem:[#allocation6 + $0x2c] sm:$0xf]  ;;  %v1772_v26 = vld [vmem:[#allocation6 + $0x38] sm:$0xf0]  ;;  %s1480_s14 = scalar_lea.hbm %s2702_s7, %s1962_s23 }
  0x4c   : > { %v1771_v25 = vor.u32 %v1933_v23, %v1770_v22  ;;  %v1775_v27 = vor.u32 %v1932_v24, %v1772_v26  ;;  %v1762_v28 = vld [vmem:[#allocation6 + $0x8] sm:$0xf]  ;;  %v1931_v29 = vld [vmem:[#allocation6 + $0x14] sm:$0xf0]  ;;  %v1930_v30 = vld [vmem:[#allocation6 + $0xc] sm:$0xf] }
  0x4d   : > { %v1764_v31 = vld [vmem:[#allocation6 + $0x18] sm:$0xf0]  ;;  %v1763_v32 = vor.u32 %v1931_v29, %v1762_v28  ;;  %v1920_v38 = vld [vmem:[#allocation9 + $0x30] sm:$0xff]  ;;  %v1918_v42 = vld [vmem:[#allocation9 + $0x20] sm:$0xff]  ;;  %s1481_s17 = sshll.u32 %s2629_s15, 4  ;;  %s1483_s20 = sshll.u32 %s1480_s14, 4  ;;  %s1482_s17 = int_to_ptr.vmem [resolvable:$true] %s1481_s17  ;;  %s1484_s20 = int_to_ptr.hbm [resolvable:$true] %s1483_s20 }
  0x4e   : > { %541 = vmatpush.bf16.msra.mxu0 %v1651_v34  ;;  %v1767_v33 = vor.u32 %v1930_v30, %v1764_v31  ;;  %v1896_v34 = vld [vmem:[%s2495_s19 + $0x10] sm:$0xff]  ;;  %v1921_v36 = vld [vmem:[#allocation9 + $0x38] sm:$0xff]  ;;  %v1926_v43 = vld [vmem:[#allocation9 + $0x60] sm:$0xff]  ;;  %s1469_s27 = scalar_lea.sflag [#allocation5], %s2489_s18  ;;  %s2238_s21 = sshra.s32 %s1484_s20, 4  ;;  %s2239_s21 = int_to_ptr.hbm [resolvable:$true] %s2238_s21 }
  0x4f   : > { %570 = vmatpush.bf16.msra.mxu1 %v1655_v35  ;;  %v1897_v35 = vld [vmem:[%s2495_s19 + $0x18] sm:$0xff]  ;;  %754 = vmatpush.bf16.msra.mxu2 %v1921_v36  ;;  %v1915_v48 = vld [vmem:[#allocation9 + $0x8] sm:$0xff]  ;;  %v1958_v3 = vld [vmem:[#allocation9 + $0xe0] sm:$0xff]  ;;  %s2240_s30 = scalar_lea.hbm %s2239_s21, 32  ;;  %s2244_s2 = scalar_lea.hbm %s2702_s7, 64 }
  0x50   : > { %v1929_v37 = vld [vmem:[#allocation9 + $0x78] sm:$0xff]  ;;  %v1928_v39 = vld [vmem:[#allocation9 + $0x70] sm:$0xff]  ;;  %v1923_v49 = vld [vmem:[#allocation9 + $0x48] sm:$0xff]  ;;  %p2241_p1 = scmp.ne.s32.totalorder %s2239_s21, %s2240_s30  ;;  %p2245_p10 = scmp.lt.s32.totalorder %s2239_s21, %s2702_s7 }
  0x51   : > { %783 = vmatpush.bf16.msra.mxu3 %v1929_v37  ;;  %v1917_v44 = vld [vmem:[#allocation9 + $0x18] sm:$0xff]  ;;  %v1916_v46 = vld [vmem:[#allocation9 + $0x10] sm:$0xff]  ;;  %v1951_v61 = vld [vmem:[#allocation9 + $0xa8] sm:$0xff]  ;;  %p2246_p12 = scmp.lt.s32.totalorder %s2244_s2, %s2240_s30 }
  0x52   : > { %542 = vmatpush.bf16.msra.mxu0 %v1643_v40  ;;  %v1919_v40 = vld [vmem:[#allocation9 + $0x28] sm:$0xff]  ;;  %v1925_v45 = vld [vmem:[#allocation9 + $0x58] sm:$0xff]  ;;  %v1924_v47 = vld [vmem:[#allocation9 + $0x50] sm:$0xff]  ;;  %p2242_p4 = pnand %p2241_p1, %p2458_p3 }
  0x53   : > { %571 = vmatpush.bf16.msra.mxu1 %v1647_v41  ;;  %755 = vmatpush.bf16.msra.mxu2 %v1920_v38  ;;  %v1927_v41 = vld [vmem:[#allocation9 + $0x68] sm:$0xff]  ;;  %v1952_v54 = vld [vmem:[#allocation9 + $0xb0] sm:$0xff]  ;;  %v1957_v18 = vld [vmem:[#allocation9 + $0xd8] sm:$0xff]  ;;  %p2247_p13 = por %p2246_p12, %p2245_p10 }
  0x54   : > { %v1960_v55 = vld [vmem:[#allocation9 + $0xf0] sm:$0xff]  ;;  %v1959_v62 = vld [vmem:[#allocation9 + $0xe8] sm:$0xff]  ;;  %v1946_v38 = vld [vmem:[#allocation9 + $0x80] sm:$0xff]  ;;  %p2243_p8 = pneg %p2242_p4 }
  0x55   : > { %784 = vmatpush.bf16.msra.mxu3 %v1928_v39  ;;  %v1955_v36 = vld [vmem:[#allocation9 + $0xc8] sm:$0xff]  ;;  %v1954_v39 = vld [vmem:[#allocation9 + $0xc0] sm:$0xff] }
  0x56   : > { %543 = vmatpush.bf16.msra.mxu0 %v1635_v50  ;;  %v1914_v50 = vld [vmem:[#allocation9] sm:$0xff]  ;;  %p2248_p0 = pnand %p2247_p13, %p2243_p8 }
  0x57   : > { %572 = vmatpush.bf16.msra.mxu1 %v1639_v51  ;;  %756 = vmatpush.bf16.msra.mxu2 %v1919_v40  ;;  %v1922_v51 = vld [vmem:[#allocation9 + $0x40] sm:$0xff] }
  0x59   : > { %544 = vmatmul.bf16.vlgmr.msra.gmra.mxu0 %v2510_v56  ;;  %785 = vmatpush.bf16.msra.mxu3 %v1927_v41 }
  0x5a   : > { %933 = vmatpush.bf16.msrb.mxu0 %v1819_v52  ;;  %573 = vmatmul.bf16.vlgmr.msra.gmra.mxu1 %v2510_v56  ;;  %v1953_v52 = vld [vmem:[#allocation9 + $0xb8] sm:$0xff] }
  0x5b   : > { %962 = vmatpush.bf16.msrb.mxu1 %v1823_v53  ;;  %757 = vmatpush.bf16.msra.mxu2 %v1918_v42  ;;  %v1961_v53 = vld [vmem:[#allocation9 + $0xf8] sm:$0xff] }
  0x5d   : > { %786 = vmatpush.bf16.msra.mxu3 %v1926_v43 }
  0x5e   : > { %934 = vmatpush.bf16.msrb.mxu0 %v1811_v59 }
  0x5f   : > { %963 = vmatpush.bf16.msrb.mxu1 %v1815_v60  ;;  %758 = vmatpush.bf16.msra.mxu2 %v1917_v44 }
  0x61   : > { %787 = vmatpush.bf16.msra.mxu3 %v1925_v45 }
  0x62   : > { %935 = vmatpush.bf16.msrb.mxu0 %v1803_v1 }
  0x63   : > { %964 = vmatpush.bf16.msrb.mxu1 %v1807_v2  ;;  %759 = vmatpush.bf16.msra.mxu2 %v1916_v46  ;;  %v1950_v2 = vld [vmem:[#allocation9 + $0xa0] sm:$0xff] }
  0x65   : > { %788 = vmatpush.bf16.msra.mxu3 %v1924_v47 }
  0x66   : > { %936 = vmatpush.bf16.msrb.mxu0 %v1795_v7 }
  0x67   : > { %965 = vmatpush.bf16.msrb.mxu1 %v1799_v8  ;;  %760 = vmatpush.bf16.msra.mxu2 %v1915_v48 }
  0x69   : > { %549 = vmatmul.bf16.gmra.mxu0 %v1895_v17  ;;  %789 = vmatpush.bf16.msra.mxu3 %v1923_v49 }
  0x6a   : > { %937 = vmatpush.bf16.msrb.mxu0 %v1787_v13  ;;  %578 = vmatmul.bf16.gmra.mxu1 %v1895_v17 }
  0x6b   : > { %966 = vmatpush.bf16.msrb.mxu1 %v1791_v14  ;;  %761 = vmatpush.bf16.msra.mxu2 %v1914_v50 }
  0x6d   : > { %790 = vmatpush.bf16.msra.mxu3 %v1922_v51 }
  0x6e   : > { %938 = vmatpush.bf16.msrb.mxu0 %v1779_v20  ;;  %v1948_v20 = vld [vmem:[#allocation9 + $0x90] sm:$0xff] }
  0x6f   : > { %967 = vmatpush.bf16.msrb.mxu1 %v1783_v21  ;;  %1151 = vmatpush.bf16.msrb.mxu2 %v1953_v52  ;;  %v1956_v21 = vld [vmem:[#allocation9 + $0xd0] sm:$0xff] }
  0x71   : > { %1180 = vmatpush.bf16.msrb.mxu3 %v1961_v53 }
  0x72   : > { %939 = vmatpush.bf16.msrb.mxu0 %v1771_v25 }
  0x73   : > { %968 = vmatpush.bf16.msrb.mxu1 %v1775_v27  ;;  %1152 = vmatpush.bf16.msrb.mxu2 %v1952_v54 }
  0x75   : > { %1181 = vmatpush.bf16.msrb.mxu3 %v1960_v55 }
  0x76   : > { %940 = vmatpush.bf16.msrb.mxu0 %v1763_v32 }
  0x77   : > { %969 = vmatpush.bf16.msrb.mxu1 %v1767_v33  ;;  %1153 = vmatpush.bf16.msrb.mxu2 %v1951_v61 }
  0x79   : > { %554 = vmatmul.bf16.gmra.mxu0 %v1896_v34  ;;  %1182 = vmatpush.bf16.msrb.mxu3 %v1959_v62 }
  0x7a   : > { %583 = vmatmul.bf16.gmra.mxu1 %v1896_v34 }
  0x7b   : > { %1154 = vmatpush.bf16.msrb.mxu2 %v1950_v2 }
  0x7d   : > { %1183 = vmatpush.bf16.msrb.mxu3 %v1958_v3 }
  0x81   : > { %1184 = vmatpush.bf16.msrb.mxu3 %v1957_v18 }
  0x85   : > { %1185 = vmatpush.bf16.msrb.mxu3 %v1956_v21 }
  0x89   : > { %559 = vmatmul.bf16.gmra.mxu0 %v1897_v35  ;;  %1186 = vmatpush.bf16.msrb.mxu3 %v1955_v36 }
  0x8a   : > { %588 = vmatmul.bf16.gmra.mxu1 %v1897_v35 }
  0x8d   : > { %1187 = vmatpush.bf16.msrb.mxu3 %v1954_v39 }
  0x99   : > { %941 = vmatmul.bf16.vlgmr.msrb.gmra.mxu0 %v2510_v56 }
  0x9a   : > { %970 = vmatmul.bf16.vlgmr.msrb.gmra.mxu1 %v2510_v56  ;;  %v423_v56 = vld [vmem:[#allocation8] sm:$0x3] }
  0x9b   : > { %v424_v57 = vunpack.c.l.bf16 %v423_v56 }
  0x9d   : > { %v426_v58 = vperm.slane %v424_v57, 0  ;;  %v427_v60 = vperm.slane %v424_v57, 2  ;;  %v844_v57 = vld [vmem:[#allocation8 + $0x2] sm:$0x3] }
  0x9f   : > { %v2519_v0 = vperm.slane %v426_v58, 0  ;;  %v2521_v1 = vperm.slane %v427_v60, 0 }
  0xa9   : > { %946 = vmatmul.bf16.gmra.mxu0 %v1895_v17 }
  0xaa   : > { %975 = vmatmul.bf16.gmra.mxu1 %v1895_v17  ;;  %v1949_v17 = vld [vmem:[#allocation9 + $0x98] sm:$0xff] }
  0xab   : > { %1155 = vmatpush.bf16.msrb.mxu2 %v1949_v17 }
  0xaf   : > { %1156 = vmatpush.bf16.msrb.mxu2 %v1948_v20 }
  0xb9   : > { %951 = vmatmul.bf16.gmra.mxu0 %v1896_v34 }
  0xba   : > { %980 = vmatmul.bf16.gmra.mxu1 %v1896_v34 }
  0xc9   : > { %956 = vmatmul.bf16.gmra.mxu0 %v1897_v35 }
  0xca   : > { %985 = vmatmul.bf16.gmra.mxu1 %v1897_v35  ;;  %v1947_v35 = vld [vmem:[#allocation9 + $0x88] sm:$0xff] }
  0xcb   : > { %1157 = vmatpush.bf16.msrb.mxu2 %v1947_v35 }
  0xcf   : > { %1158 = vmatpush.bf16.msrb.mxu2 %v1946_v38 }
  0xd6   : > { %v545_v59 = vpop.f32.mrf.mxu0 }
  0xd7   : > { %v574_v63 = vpop.f32.mrf.mxu1  ;;  %v546_v4 = vadd.f32 %v545_v59, %v2519_v0 }
  0xd8   : > { %v575_v5 = vadd.f32 %v574_v63, %v2521_v1  ;;  %v845_v63 = vunpack.c.l.bf16 %v844_v57 }
  0xd9   : > { %v594_v10 = vmax.f32 %v546_v4, 0.0 }
  0xda   : > { %v595_v12 = vmax.f32 %v575_v5, 0.0 }
  0xde   : > { %v547_v6 = vpop.f32.mrf.mxu0 }
  0xdf   : > { %v548_v7 = vadd.f32 %v547_v6, %v2519_v0  ;;  %v576_v8 = vpop.f32.mrf.mxu1  ;;  %v847_v6 = vperm.slane %v845_v63, 0 }
  0xe0   : > { %v577_v9 = vadd.f32 %v576_v8, %v2521_v1  ;;  %v848_v8 = vperm.slane %v845_v63, 2 }
  0xe1   : > { %v596_v11 = vmax.f32 %v548_v7, 0.0 }
  0xe2   : > { %v597_v13 = vmax.f32 %v577_v9, 0.0 }
  0xe3   : > { %v618_v14 = vpack.c.bf16 %v596_v11, %v594_v10  ;;  %v851_v10 = vperm.slane %v847_v6, 0  ;;  %v852_v11 = vperm.slane %v848_v8, 0 }
  0xe4   : > { %v619_v15 = vpack.c.bf16 %v597_v13, %v595_v12 }
  0xe5   : > { %762 = vmatmul.bf16.vlgmr.msra.gmra.mxu2 %v618_v14 }
  0xe6   : > { %791 = vmatmul.bf16.vlgmr.msra.gmra.mxu3 %v619_v15  ;;  %v550_v16 = vpop.f32.mrf.mxu0 }
  0xe7   : > { %v579_v19 = vpop.f32.mrf.mxu1  ;;  %v551_v22 = vadd.f32 %v550_v16, %v2519_v0 }
  0xe8   : > { %v580_v23 = vadd.f32 %v579_v19, %v2521_v1 }
  0xe9   : > { %v598_v28 = vmax.f32 %v551_v22, 0.0 }
  0xea   : > { %v599_v30 = vmax.f32 %v580_v23, 0.0 }
  0xee   : > { %v552_v24 = vpop.f32.mrf.mxu0 }
  0xef   : > { %v553_v25 = vadd.f32 %v552_v24, %v2519_v0  ;;  %v581_v26 = vpop.f32.mrf.mxu1 }
  0xf0   : > { %v582_v27 = vadd.f32 %v581_v26, %v2521_v1 }
  0xf1   : > { %v600_v29 = vmax.f32 %v553_v25, 0.0 }
  0xf2   : > { %v601_v31 = vmax.f32 %v582_v27, 0.0 }
  0xf3   : > { %v620_v32 = vpack.c.bf16 %v600_v29, %v598_v28 }
  0xf4   : > { %v621_v33 = vpack.c.bf16 %v601_v31, %v599_v30 }
  0xf5   : > { %767 = vmatmul.bf16.gmra.mxu2 %v620_v32 }
  0xf6   : > { %796 = vmatmul.bf16.gmra.mxu3 %v621_v33  ;;  %v555_v34 = vpop.f32.mrf.mxu0 }
  0xf7   : > { %v584_v37 = vpop.f32.mrf.mxu1  ;;  %v556_v40 = vadd.f32 %v555_v34, %v2519_v0 }
  0xf8   : > { %v585_v41 = vadd.f32 %v584_v37, %v2521_v1 }
  0xf9   : > { %v602_v46 = vmax.f32 %v556_v40, 0.0 }
  0xfa   : > { %v603_v48 = vmax.f32 %v585_v41, 0.0 }
  0xfe   : > { %v557_v42 = vpop.f32.mrf.mxu0 }
  0xff   : > { %v558_v43 = vadd.f32 %v557_v42, %v2519_v0  ;;  %v586_v44 = vpop.f32.mrf.mxu1 }
 0x100   : > { %v587_v45 = vadd.f32 %v586_v44, %v2521_v1 }
 0x101   : > { %v604_v47 = vmax.f32 %v558_v43, 0.0 }
 0x102   : > { %v605_v49 = vmax.f32 %v587_v45, 0.0 }
 0x103   : > { %v622_v50 = vpack.c.bf16 %v604_v47, %v602_v46 }
 0x104   : > { %v623_v51 = vpack.c.bf16 %v605_v49, %v603_v48 }
 0x105   : > { %772 = vmatmul.bf16.gmra.mxu2 %v622_v50 }
 0x106   : > { %801 = vmatmul.bf16.gmra.mxu3 %v623_v51  ;;  %v560_v52 = vpop.f32.mrf.mxu0 }
 0x107   : > { %v589_v53 = vpop.f32.mrf.mxu1  ;;  %v561_v54 = vadd.f32 %v560_v52, %v2519_v0 }
 0x108   : > { %v590_v55 = vadd.f32 %v589_v53, %v2521_v1 }
 0x109   : > { %v606_v61 = vmax.f32 %v561_v54, 0.0 }
 0x10a   : > { %v607_v2 = vmax.f32 %v590_v55, 0.0 }
 0x10e   : > { %v562_v56 = vpop.f32.mrf.mxu0 }
 0x10f   : > { %v563_v58 = vadd.f32 %v562_v56, %v2519_v0  ;;  %v591_v59 = vpop.f32.mrf.mxu1 }
 0x110   : > { %v592_v60 = vadd.f32 %v591_v59, %v2521_v1 }
 0x111   : > { %v608_v62 = vmax.f32 %v563_v58, 0.0 }
 0x112   : > { %v609_v3 = vmax.f32 %v592_v60, 0.0 }
 0x113   : > { %v624_v4 = vpack.c.bf16 %v608_v62, %v606_v61 }
 0x114   : > { %v625_v5 = vpack.c.bf16 %v609_v3, %v607_v2 }
 0x115   : > { %777 = vmatmul.bf16.gmra.mxu2 %v624_v4 }
 0x116   : > { %806 = vmatmul.bf16.gmra.mxu3 %v625_v5  ;;  %v942_v7 = vpop.f32.mrf.mxu0 }
 0x117   : > { %v971_v9 = vpop.f32.mrf.mxu1  ;;  %v943_v12 = vadd.f32 %v942_v7, %v851_v10 }
 0x118   : > { %v972_v0 = vadd.f32 %v971_v9, %v852_v11 }
 0x119   : > { %v991_v16 = vmax.f32 %v943_v12, 0.0 }
 0x11a   : > { %v992_v18 = vmax.f32 %v972_v0, 0.0 }
 0x11e   : > { %v944_v13 = vpop.f32.mrf.mxu0 }
 0x11f   : > { %v945_v14 = vadd.f32 %v944_v13, %v851_v10  ;;  %v973_v1 = vpop.f32.mrf.mxu1 }
 0x120   : > { %v974_v15 = vadd.f32 %v973_v1, %v852_v11 }
 0x121   : > { %v993_v17 = vmax.f32 %v945_v14, 0.0 }
 0x122   : > { %v994_v19 = vmax.f32 %v974_v15, 0.0 }
 0x123   : > { %v1015_v20 = vpack.c.bf16 %v993_v17, %v991_v16 }
 0x124   : > { %v1016_v21 = vpack.c.bf16 %v994_v19, %v992_v18 }
 0x125   : > { %1159 = vmatmul.bf16.vlgmr.msrb.gmra.mxu2 %v1015_v20 }
 0x126   : > { %1188 = vmatmul.bf16.vlgmr.msrb.gmra.mxu3 %v1016_v21  ;;  %v947_v22 = vpop.f32.mrf.mxu0 }
 0x127   : > { %v976_v23 = vpop.f32.mrf.mxu1  ;;  %v948_v24 = vadd.f32 %v947_v22, %v851_v10 }
 0x128   : > { %v977_v25 = vadd.f32 %v976_v23, %v852_v11 }
 0x129   : > { %v995_v30 = vmax.f32 %v948_v24, 0.0  ;;  %v1252_v24 = vld [vmem:[%s2699_s4] sm:$0x1] }
 0x12a   : > { %v996_v32 = vmax.f32 %v977_v25, 0.0  ;;  %v399_v25 = vld [vmem:[%s2495_s19] sm:$0xff]  }
 0x12e   : > { %v949_v26 = vpop.f32.mrf.mxu0 }
 0x12f   : > { %v950_v27 = vadd.f32 %v949_v26, %v851_v10  ;;  %v978_v28 = vpop.f32.mrf.mxu1 }
 0x130   : > { %v979_v29 = vadd.f32 %v978_v28, %v852_v11 }
 0x131   : > { %v997_v31 = vmax.f32 %v950_v27, 0.0  ;;  %v1253_v27 = vunpack.c.l.bf16 %v1252_v24 }
 0x132   : > { %v998_v33 = vmax.f32 %v979_v29, 0.0 }
 0x133   : > { %v1017_v34 = vpack.c.bf16 %v997_v31, %v995_v30  ;;  %v1228_v30 = vunpack.c.l.bf16 %v399_v25 }
 0x134   : > { %v1018_v35 = vpack.c.bf16 %v998_v33, %v996_v32  ;;  %v1254_v32 = vperm.slane %v1253_v27, 0 }
 0x135   : > { %1164 = vmatmul.bf16.gmra.mxu2 %v1017_v34 }
 0x136   : > { %1193 = vmatmul.bf16.gmra.mxu3 %v1018_v35  ;;  %v952_v36 = vpop.f32.mrf.mxu0 }
 0x137   : > { %v981_v37 = vpop.f32.mrf.mxu1  ;;  %v953_v38 = vadd.f32 %v952_v36, %v851_v10 }
 0x138   : > { %v982_v39 = vadd.f32 %v981_v37, %v852_v11 }
 0x139   : > { %v999_v44 = vmax.f32 %v953_v38, 0.0  ;;  %v1229_v38 = vunpack.c.h.bf16 %v399_v25  ;;  %v2323_v25 = vmov 128.0  }
 0x13a   : > { %v1000_v46 = vmax.f32 %v982_v39, 0.0  ;;  %2086 = vrcp.f32 %v2323_v25 }
 0x13e   : > { %v954_v40 = vpop.f32.mrf.mxu0 }
 0x13f   : > { %v955_v41 = vadd.f32 %v954_v40, %v851_v10  ;;  %v983_v42 = vpop.f32.mrf.mxu1 }
 0x140   : > { %v984_v43 = vadd.f32 %v983_v42, %v852_v11 }
 0x141   : > { %v1001_v45 = vmax.f32 %v955_v41, 0.0  ;;  %v401_v41 = vld [vmem:[%s2495_s19 + $0x8] sm:$0xff]  }
 0x142   : > { %v1002_v47 = vmax.f32 %v984_v43, 0.0 }
 0x143   : > { %v1019_v48 = vpack.c.bf16 %v1001_v45, %v999_v44 }
 0x144   : > { %v1020_v49 = vpack.c.bf16 %v1002_v47, %v1000_v46  ;;  %v1230_v46 = vunpack.c.l.bf16 %v401_v41 }
 0x145   : > { %1169 = vmatmul.bf16.gmra.mxu2 %v1019_v48 }
 0x146   : > { %1198 = vmatmul.bf16.gmra.mxu3 %v1020_v49  ;;  %v957_v50 = vpop.f32.mrf.mxu0 }
 0x147   : > { %v986_v51 = vpop.f32.mrf.mxu1  ;;  %v958_v52 = vadd.f32 %v957_v50, %v851_v10 }
 0x148   : > { %v987_v53 = vadd.f32 %v986_v51, %v852_v11 }
 0x149   : > { %v1003_v58 = vmax.f32 %v958_v52, 0.0 }
 0x14a   : > { %v1004_v60 = vmax.f32 %v987_v53, 0.0  ;;  %v1231_v53 = vunpack.c.h.bf16 %v401_v41 }
 0x14e   : > { %v959_v54 = vpop.f32.mrf.mxu0 }
 0x14f   : > { %v960_v55 = vadd.f32 %v959_v54, %v851_v10  ;;  %v988_v56 = vpop.f32.mrf.mxu1 }
 0x150   : > { %v989_v57 = vadd.f32 %v988_v56, %v852_v11  ;;  %v403_v56 = vld [vmem:[%s2495_s19 + $0x10] sm:$0xff]  }
 0x151   : > { %v1005_v59 = vmax.f32 %v960_v55, 0.0 }
 0x152   : > { %v1006_v61 = vmax.f32 %v989_v57, 0.0 }
 0x153   : > { %v1021_v62 = vpack.c.bf16 %v1005_v59, %v1003_v58 }
 0x154   : > { %v1022_v63 = vpack.c.bf16 %v1006_v61, %v1004_v60  ;;  %v1232_v61 = vunpack.c.l.bf16 %v403_v56 }
 0x155   : > { %1174 = vmatmul.bf16.gmra.mxu2 %v1021_v62 }
 0x156   : > { %1203 = vmatmul.bf16.gmra.mxu3 %v1022_v63 }
 0x168   : > { %v763_v2 = vpop.f32.mrf.mxu2 }
 0x169   : > { %v792_v3 = vpop.f32.mrf.mxu3 }
 0x16a   : > { %v793_v4 = vadd.f32 %v792_v3, %v763_v2 }
 0x170   : > { %v765_v5 = vpop.f32.mrf.mxu2 }
 0x171   : > { %v794_v6 = vpop.f32.mrf.mxu3 }
 0x172   : > { %v795_v7 = vadd.f32 %v794_v6, %v765_v5  ;;  %v1233_v6 = vunpack.c.h.bf16 %v403_v56 }
 0x178   : > { %v768_v8 = vpop.f32.mrf.mxu2 }
 0x179   : > { %v797_v9 = vpop.f32.mrf.mxu3 }
 0x17a   : > { %v798_v12 = vadd.f32 %v797_v9, %v768_v8  ;;  %v405_v9 = vld [vmem:[%s2495_s19 + $0x18] sm:$0xff]  }
 0x180   : > { %v770_v10 = vpop.f32.mrf.mxu2 }
 0x181   : > { %v799_v11 = vpop.f32.mrf.mxu3 }
 0x182   : > { %v800_v0 = vadd.f32 %v799_v11, %v770_v10 }
 0x188   : > { %v773_v13 = vpop.f32.mrf.mxu2 }
 0x189   : > { %v802_v14 = vpop.f32.mrf.mxu3 }
 0x18a   : > { %v803_v1 = vadd.f32 %v802_v14, %v773_v13  ;;  %v1234_v13 = vunpack.c.l.bf16 %v405_v9 }
 0x190   : > { %v775_v15 = vpop.f32.mrf.mxu2 }
 0x191   : > { %v804_v16 = vpop.f32.mrf.mxu3 }
 0x192   : > { %v805_v17 = vadd.f32 %v804_v16, %v775_v15 }
 0x198   : > { %v778_v18 = vpop.f32.mrf.mxu2 }
 0x199   : > { %v807_v19 = vpop.f32.mrf.mxu3 }
 0x19a   : > { %v2539_v20 = vadd.f32 %v807_v19, %v778_v18 }
 0x1a0   : > { %v780_v21 = vpop.f32.mrf.mxu2 }
 0x1a1   : > { %v809_v22 = vpop.f32.mrf.mxu3 }
 0x1a2   : > { %v2541_v23 = vadd.f32 %v809_v22, %v780_v21  ;;  %v1235_v21 = vunpack.c.h.bf16 %v405_v9 }
 0x1a8   : > { %v1160_v26 = vpop.f32.mrf.mxu2 }
 0x1a9   : > { %v1189_v28 = vpop.f32.mrf.mxu3 }
 0x1aa   : > { %v1190_v29 = vadd.f32 %v1189_v28, %v1160_v26  ;;  %v2087_v26 = vpop.eup %2086 }
 0x1ab   : > { %v1280_v27 = vmul.f32 128.0, %v2087_v26  ;;  %vm1284_vm0 = vweird.f32 %v2087_v26 }
 0x1ac   : > { %v1209_v31 = vadd.f32 %v1190_v29, %v793_v4 }
 0x1ad   : > { %v1281_v28 = vsub.f32 1.0, %v1280_v27 }
 0x1ae   : > { %v1244_v33 = vadd.f32 %v1228_v30, %v1209_v31 }
 0x1af   : > { %v1282_v29 = vmul.f32 %v2087_v26, %v1281_v28 }
 0x1b0   : > { %v1162_v34 = vpop.f32.mrf.mxu2  ;;  %v2547_v35 = vadd.f32 %v1254_v32, %v1244_v33 }
 0x1b1   : > { %v1191_v36 = vpop.f32.mrf.mxu3  ;;  %v1283_v30 = vadd.f32 %v2087_v26, %v1282_v29 }
 0x1b2   : > { %v1192_v37 = vadd.f32 %v1191_v36, %v1162_v34  ;;  %1263 = vadd.xlane.f32.xlu0 %v2547_v35 }
 0x1b4   : > { %v1210_v39 = vadd.f32 %v1192_v37, %v795_v7 }
 0x1b6   : > { %v1245_v40 = vadd.f32 %v1229_v38, %v1210_v39 }
 0x1b8   : > { %v1165_v42 = vpop.f32.mrf.mxu2  ;;  %v2551_v43 = vadd.f32 %v1254_v32, %v1245_v40 }
 0x1b9   : > { %v1194_v44 = vpop.f32.mrf.mxu3 }
 0x1ba   : > { %v1195_v45 = vadd.f32 %v1194_v44, %v1165_v42  ;;  %1265 = vadd.xlane.f32.xlu0 %v2551_v43 }
 0x1bc   : > { %v1211_v47 = vadd.f32 %v1195_v45, %v798_v12 }
 0x1be   : > { %v1246_v48 = vadd.f32 %v1230_v46, %v1211_v47 }
 0x1c0   : > { %v1167_v49 = vpop.f32.mrf.mxu2  ;;  %v2554_v50 = vadd.f32 %v1254_v32, %v1246_v48 }
 0x1c1   : > { %v1196_v51 = vpop.f32.mrf.mxu3 }
 0x1c2   : > { %v1197_v52 = vadd.f32 %v1196_v51, %v1167_v49  ;;  %1267 = vadd.xlane.f32.xlu1 %v2554_v50 }
 0x1c4   : > { %v1212_v54 = vadd.f32 %v1197_v52, %v800_v0 }
 0x1c6   : > { %v1247_v55 = vadd.f32 %v1231_v53, %v1212_v54 }
 0x1c8   : > { %v1170_v57 = vpop.f32.mrf.mxu2  ;;  %v1258_v58 = vadd.f32 %v1254_v32, %v1247_v55 }
 0x1c9   : > { %v1199_v59 = vpop.f32.mrf.mxu3 }
 0x1ca   : > { %v1200_v60 = vadd.f32 %v1199_v59, %v1170_v57  ;;  %1269 = vadd.xlane.f32.xlu1 %v1258_v58 }
 0x1cc   : > { %v1213_v62 = vadd.f32 %v1200_v60, %v803_v1 }
 0x1ce   : > { %v1248_v63 = vadd.f32 %v1232_v61, %v1213_v62 }
 0x1d0   : > { %v1172_v2 = vpop.f32.mrf.mxu2  ;;  %v1259_v3 = vadd.f32 %v1254_v32, %v1248_v63 }
 0x1d1   : > { %v1201_v4 = vpop.f32.mrf.mxu3 }
 0x1d2   : > { %v1202_v5 = vadd.f32 %v1201_v4, %v1172_v2  ;;  %1271 = vadd.xlane.f32.xlu2 %v1259_v3 }
 0x1d4   : > { %v1214_v7 = vadd.f32 %v1202_v5, %v805_v17 }
 0x1d6   : > { %v1249_v8 = vadd.f32 %v1233_v6, %v1214_v7 }
 0x1d8   : > { %v1175_v12 = vpop.f32.mrf.mxu2  ;;  %v1260_v10 = vadd.f32 %v1254_v32, %v1249_v8 }
 0x1d9   : > { %v1204_v11 = vpop.f32.mrf.mxu3 }
 0x1da   : > { %v1205_v0 = vadd.f32 %v1204_v11, %v1175_v12  ;;  %1273 = vadd.xlane.f32.xlu2 %v1260_v10 }
 0x1dc   : > { %v1215_v14 = vadd.f32 %v1205_v0, %v2539_v20  ;;  %v2561_v20 = vsel %vm1284_vm0, %v2087_v26, %v1283_v30 }
 0x1de   : > { %v1250_v15 = vadd.f32 %v1234_v13, %v1215_v14  ;;  %v1430_v14 = vld [vmem:[%s2700_s5] sm:$0x1] }
 0x1e0   : > { %v1177_v1 = vpop.f32.mrf.mxu2  ;;  %v1261_v16 = vadd.f32 %v1254_v32, %v1250_v15 }
 0x1e1   : > { %v1206_v18 = vpop.f32.mrf.mxu3 }
 0x1e2   : > { %v1207_v19 = vadd.f32 %v1206_v18, %v1177_v1  ;;  %1275 = vadd.xlane.f32.xlu0 %v1261_v16  ;;  %v1431_v18 = vunpack.c.l.bf16 %v1430_v14 }
 0x1e4   : > { %v1216_v22 = vadd.f32 %v1207_v19, %v2541_v23  ;;  %v1441_v19 = vld [vmem:[%s2701_s6] sm:$0x1]  ;;  %v2616_v27 = vperm.slane %v1431_v18, 0 }
 0x1e5   : > { %v1442_v28 = vunpack.c.l.bf16 %v1441_v19 }
 0x1e6   : > { %v1251_v17 = vadd.f32 %v1235_v21, %v1216_v22 }
 0x1e8   : > { %v1262_v24 = vadd.f32 %v1254_v32, %v1251_v17 }
 0x1ea   : > { %1277 = vadd.xlane.f32.xlu1 %v1262_v24 }
 0x225   : > { %v1264_v31 = vpop.xlane.xlu0 %1263 }
 0x226   : > { %v1286_v33 = vmul.f32 %v2561_v20, %v1264_v31 }
 0x228   : > { %v2565_v34 = vsub.f32 %v2547_v35, %v1286_v33 }
 0x22a   : > { %v1302_v23 = vmul.f32 %v2565_v34, %v2565_v34 }
 0x22c   : > { %1310 = vadd.xlane.f32.xlu2 %v1302_v23 }
 0x22d   : > { %v1266_v32 = vpop.xlane.xlu0 %1265 }
 0x22e   : > { %v1287_v36 = vmul.f32 %v2561_v20, %v1266_v32 }
 0x230   : > { %v2571_v37 = vsub.f32 %v2551_v43, %v1287_v36  ;;  %v2619_v36 = vperm.slane %v1442_v28, 0 }
 0x232   : > { %v1303_v38 = vmul.f32 %v2571_v37, %v2571_v37 }
 0x234   : > { %1312 = vadd.xlane.f32.xlu0 %v1303_v38 }
 0x235   : > { %v1268_v39 = vpop.xlane.xlu1 %1267 }
 0x236   : > { %v1288_v40 = vmul.f32 %v2561_v20, %v1268_v39 }
 0x238   : > { %v2577_v35 = vsub.f32 %v2554_v50, %v1288_v40 }
 0x23a   : > { %v1304_v41 = vmul.f32 %v2577_v35, %v2577_v35 }
 0x23c   : > { %1314 = vadd.xlane.f32.xlu1 %v1304_v41 }
 0x23d   : > { %v1270_v42 = vpop.xlane.xlu1 %1269 }
 0x23e   : > { %v1289_v44 = vmul.f32 %v2561_v20, %v1270_v42 }
 0x240   : > { %v2582_v45 = vsub.f32 %v1258_v58, %v1289_v44 }
 0x242   : > { %v1305_v43 = vmul.f32 %v2582_v45, %v2582_v45 }
 0x244   : > { %1316 = vadd.xlane.f32.xlu2 %v1305_v43 }
 0x245   : > { %v1272_v46 = vpop.xlane.xlu2 %1271 }
 0x246   : > { %v1290_v47 = vmul.f32 %v2561_v20, %v1272_v46 }
 0x248   : > { %v2587_v48 = vsub.f32 %v1259_v3, %v1290_v47 }
 0x24a   : > { %v1306_v49 = vmul.f32 %v2587_v48, %v2587_v48 }
 0x24c   : > { %1318 = vadd.xlane.f32.xlu0 %v1306_v49 }
 0x24d   : > { %v1274_v50 = vpop.xlane.xlu2 %1273 }
 0x24e   : > { %v1291_v51 = vmul.f32 %v2561_v20, %v1274_v50 }
 0x250   : > { %v2592_v52 = vsub.f32 %v1260_v10, %v1291_v51 }
 0x252   : > { %v1307_v53 = vmul.f32 %v2592_v52, %v2592_v52 }
 0x254   : > { %1320 = vadd.xlane.f32.xlu1 %v1307_v53 }
 0x255   : > { %v1276_v54 = vpop.xlane.xlu0 %1275 }
 0x256   : > { %v1292_v55 = vmul.f32 %v2561_v20, %v1276_v54 }
 0x258   : > { %v2597_v56 = vsub.f32 %v1261_v16, %v1292_v55 }
 0x25a   : > { %v1308_v57 = vmul.f32 %v2597_v56, %v2597_v56 }
 0x25c   : > { %1322 = vadd.xlane.f32.xlu2 %v1308_v57 }
 0x25d   : > { %v1278_v58 = vpop.xlane.xlu1 %1277 }
 0x25e   : > { %v1293_v59 = vmul.f32 %v2561_v20, %v1278_v58 }
 0x260   : > { %v2602_v60 = vsub.f32 %v1262_v24, %v1293_v59 }
 0x262   : > { %v1309_v61 = vmul.f32 %v2602_v60, %v2602_v60 }
 0x264   : > { %1324 = vadd.xlane.f32.xlu0 %v1309_v61 }
 0x29f   : > { %v1311_v62 = vpop.xlane.xlu2 %1310 }
 0x2a0   : > { %v1326_v63 = vmul.f32 %v1311_v62, %v2561_v20 }
 0x2a2   : > { %v1334_v2 = vadd.f32 1e-07, %v1326_v63 }
 0x2a4   : > { %2088 = vrsqrt.f32 %v1334_v2  ;;  %vm1348_vm2 = vweird.f32 %v1334_v2 }
 0x2a7   : > { %v1313_v3 = vpop.xlane.xlu0 %1312 }
 0x2a8   : > { %v1327_v4 = vmul.f32 %v1313_v3, %v2561_v20 }
 0x2aa   : > { %v2089_v5 = vpop.eup %2088  ;;  %v1335_v6 = vadd.f32 1e-07, %v1327_v4 }
 0x2ab   : > { %v1343_v7 = vmul.f32 %v2089_v5, %v1334_v2  ;;  %vm1349_vm1 = vweird.f32 %v2089_v5 }
 0x2ac   : > { %2090 = vrsqrt.f32 %v1335_v6  ;;  %vm1350_vm3 = vmor %vm1348_vm2, %vm1349_vm1  ;;  %vm1358_vm5 = vweird.f32 %v1335_v6 }
 0x2ad   : > { %v1344_v8 = vmul.f32 %v2089_v5, %v1343_v7 }
 0x2af   : > { %v1345_v9 = vmul.f32 0.5, %v1344_v8  ;;  %v1315_v12 = vpop.xlane.xlu1 %1314 }
 0x2b0   : > { %v1328_v10 = vmul.f32 %v1315_v12, %v2561_v20 }
 0x2b1   : > { %v1346_v11 = vsub.f32 1.5, %v1345_v9 }
 0x2b2   : > { %v2091_v0 = vpop.eup %2090  ;;  %v1336_v13 = vadd.f32 1e-07, %v1328_v10 }
 0x2b3   : > { %v1347_v15 = vmul.f32 %v2089_v5, %v1346_v11  ;;  %v1353_v1 = vmul.f32 %v2091_v0, %v1335_v6  ;;  %vm1359_vm4 = vweird.f32 %v2091_v0 }
 0x2b4   : > { %2092 = vrsqrt.f32 %v1336_v13  ;;  %vm1360_vm6 = vmor %vm1358_vm5, %vm1359_vm4  ;;  %vm1368_vm8 = vweird.f32 %v1336_v13 }
 0x2b5   : > { %v1354_v16 = vmul.f32 %v2091_v0, %v1353_v1  ;;  %v1351_v21 = vsel %vm1350_vm3, %v2089_v5, %v1347_v15 }
 0x2b6   : > { %v1422_v29 = vmul.f32 %v1351_v21, %v2565_v34 }
 0x2b7   : > { %v1355_v22 = vmul.f32 0.5, %v1354_v16  ;;  %v1317_v17 = vpop.xlane.xlu2 %1316 }
 0x2b8   : > { %v1329_v24 = vmul.f32 %v1317_v17, %v2561_v20  ;;  %v1433_v38 = vmul.f32 %v2616_v27, %v1422_v29 }
 0x2b9   : > { %v1356_v25 = vsub.f32 1.5, %v1355_v22 }
 0x2ba   : > { %v2093_v26 = vpop.eup %2092  ;;  %v1337_v30 = vadd.f32 1e-07, %v1329_v24  ;;  %v1444_v46 = vadd.f32 %v2619_v36, %v1433_v38 }
 0x2bb   : > { %v1357_v31 = vmul.f32 %v2091_v0, %v1356_v25  ;;  %v1363_v33 = vmul.f32 %v2093_v26, %v1336_v13  ;;  %vm1369_vm7 = vweird.f32 %v2093_v26 }
 0x2bc   : > { %2094 = vrsqrt.f32 %v1337_v30  ;;  %vm1370_vm9 = vmor %vm1368_vm8, %vm1369_vm7  ;;  %vm1378_vm11 = vweird.f32 %v1337_v30 }
 0x2bd   : > { %v1361_v23 = vsel %vm1360_vm6, %v2091_v0, %v1357_v31  ;;  %v1364_v32 = vmul.f32 %v2093_v26, %v1363_v33 }
 0x2be   : > { %v1423_v39 = vmul.f32 %v1361_v23, %v2571_v37 }
 0x2bf   : > { %v1365_v40 = vmul.f32 0.5, %v1364_v32  ;;  %v1319_v41 = vpop.xlane.xlu0 %1318 }
 0x2c0   : > { %v1434_v42 = vmul.f32 %v2616_v27, %v1423_v39  ;;  %v1330_v34 = vmul.f32 %v1319_v41, %v2561_v20 }
 0x2c1   : > { %v1366_v44 = vsub.f32 1.5, %v1365_v40 }
 0x2c2   : > { %v2095_v43 = vpop.eup %2094  ;;  %v1445_v47 = vadd.f32 %v2619_v36, %v1434_v42  ;;  %v1338_v49 = vadd.f32 1e-07, %v1330_v34 }
 0x2c3   : > { %v1367_v50 = vmul.f32 %v2093_v26, %v1366_v44  ;;  %v1373_v51 = vmul.f32 %v2095_v43, %v1337_v30  ;;  %vm1379_vm10 = vweird.f32 %v2095_v43 }
 0x2c4   : > { %v1966_v53 = vpack.c.bf16 %v1445_v47, %v1444_v46  ;;  %2096 = vrsqrt.f32 %v1338_v49  ;;  %vm1380_vm12 = vmor %vm1378_vm11, %vm1379_vm10  ;;  %vm1388_vm14 = vweird.f32 %v1338_v49 }
 0x2c5   : > { %v1374_v37 = vmul.f32 %v2095_v43, %v1373_v51  ;;  %v1371_v54 = vsel %vm1370_vm9, %v2093_v26, %v1367_v50 }
 0x2c6   : > { %1967 = vst [vmem:[%s2629_s15] sm:$0xff] %v1966_v53   ;;  %v1424_v62 = vmul.f32 %v1371_v54, %v2577_v35 }
 0x2c7   : > { %v1375_v55 = vmul.f32 0.5, %v1374_v37  ;;  %v1321_v57 = vpop.xlane.xlu1 %1320 }
 0x2c8   : > { %v1331_v58 = vmul.f32 %v1321_v57, %v2561_v20  ;;  %v1435_v6 = vmul.f32 %v2616_v27, %v1424_v62 }
 0x2c9   : > { %v1376_v59 = vsub.f32 1.5, %v1375_v55 }
 0x2ca   : > { %v2097_v61 = vpop.eup %2096  ;;  %v1339_v63 = vadd.f32 1e-07, %v1331_v58  ;;  %v1446_v0 = vadd.f32 %v2619_v36, %v1435_v6 }
 0x2cb   : > { %v1377_v2 = vmul.f32 %v2095_v43, %v1376_v59  ;;  %v1383_v3 = vmul.f32 %v2097_v61, %v1338_v49  ;;  %vm1389_vm13 = vweird.f32 %v2097_v61 }
 0x2cc   : > { %2098 = vrsqrt.f32 %v1339_v63  ;;  %vm1390_vm15 = vmor %vm1388_vm14, %vm1389_vm13  ;;  %vm1398_vm1 = vweird.f32 %v1339_v63 }
 0x2cd   : > { %v1381_v4 = vsel %vm1380_vm12, %v2095_v43, %v1377_v2  ;;  %v1384_v5 = vmul.f32 %v2097_v61, %v1383_v3 }
 0x2ce   : > { %v1425_v7 = vmul.f32 %v1381_v4, %v2582_v45 }
 0x2cf   : > { %v1385_v8 = vmul.f32 0.5, %v1384_v5  ;;  %v1323_v9 = vpop.xlane.xlu2 %1322 }
 0x2d0   : > { %v1436_v12 = vmul.f32 %v2616_v27, %v1425_v7  ;;  %v1332_v10 = vmul.f32 %v1323_v9, %v2561_v20 }
 0x2d1   : > { %v1386_v35 = vsub.f32 1.5, %v1385_v8 }
 0x2d2   : > { %v2099_v11 = vpop.eup %2098  ;;  %v1447_v13 = vadd.f32 %v2619_v36, %v1436_v12  ;;  %v1340_v14 = vadd.f32 1e-07, %v1332_v10 }
 0x2d3   : > { %v1387_v15 = vmul.f32 %v2097_v61, %v1386_v35  ;;  %v1393_v1 = vmul.f32 %v2099_v11, %v1339_v63  ;;  %vm1399_vm0 = vweird.f32 %v2099_v11 }
 0x2d4   : > { %v1971_v16 = vpack.c.bf16 %v1447_v13, %v1446_v0  ;;  %2100 = vrsqrt.f32 %v1340_v14  ;;  %vm1400_vm2 = vmor %vm1398_vm1, %vm1399_vm0  ;;  %vm1408_vm4 = vweird.f32 %v1340_v14 }
 0x2d5   : > { %v1394_v45 = vmul.f32 %v2099_v11, %v1393_v1  ;;  %v1391_v18 = vsel %vm1390_vm15, %v2097_v61, %v1387_v15 }
 0x2d6   : > { %1983 = vst [vmem:[%s2629_s15 + $0x8] sm:$0xff] %v1971_v16   ;;  %v1426_v25 = vmul.f32 %v1391_v18, %v2587_v48 }
 0x2d7   : > { %v1395_v19 = vmul.f32 0.5, %v1394_v45  ;;  %v1325_v21 = vpop.xlane.xlu0 %1324 }
 0x2d8   : > { %v1333_v22 = vmul.f32 %v1325_v21, %v2561_v20  ;;  %v1437_v33 = vmul.f32 %v2616_v27, %v1426_v25 }
 0x2d9   : > { %v1396_v17 = vsub.f32 1.5, %v1395_v19 }
 0x2da   : > { %v2101_v24 = vpop.eup %2100  ;;  %v1341_v26 = vadd.f32 1e-07, %v1333_v22  ;;  %v1448_v48 = vadd.f32 %v2619_v36, %v1437_v33 }
 0x2db   : > { %v1397_v28 = vmul.f32 %v2099_v11, %v1396_v17  ;;  %v1403_v29 = vmul.f32 %v2101_v24, %v1340_v14  ;;  %vm1409_vm3 = vweird.f32 %v2101_v24 }
 0x2dc   : > { %2102 = vrsqrt.f32 %v1341_v26  ;;  %vm1410_vm5 = vmor %vm1408_vm4, %vm1409_vm3  ;;  %vm1418_vm7 = vweird.f32 %v1341_v26 }
 0x2dd   : > { %v1401_v30 = vsel %vm1400_vm2, %v2099_v11, %v1397_v28  ;;  %v1404_v31 = vmul.f32 %v2101_v24, %v1403_v29 }
 0x2de   : > { %v1427_v23 = vmul.f32 %v1401_v30, %v2592_v52 }
 0x2df   : > { %v1405_v32 = vmul.f32 0.5, %v1404_v31 }
 0x2e0   : > { %v1438_v20 = vmul.f32 %v2616_v27, %v1427_v23 }
 0x2e1   : > { %v1406_v38 = vsub.f32 1.5, %v1405_v32 }
 0x2e2   : > { %v2103_v39 = vpop.eup %2102  ;;  %v1449_v40 = vadd.f32 %v2619_v36, %v1438_v20 }
 0x2e3   : > { %v1407_v41 = vmul.f32 %v2101_v24, %v1406_v38  ;;  %v1413_v42 = vmul.f32 %v2103_v39, %v1341_v26  ;;  %vm1419_vm6 = vweird.f32 %v2103_v39 }
 0x2e4   : > { %v1976_v34 = vpack.c.bf16 %v1449_v40, %v1448_v48  ;;  %vm1420_vm8 = vmor %vm1418_vm7, %vm1419_vm6 }
 0x2e5   : > { %v1414_v44 = vmul.f32 %v2103_v39, %v1413_v42  ;;  %v1411_v52 = vsel %vm1410_vm5, %v2101_v24, %v1407_v41 }
 0x2e6   : > { %1984 = vst [vmem:[%s2629_s15 + $0x10] sm:$0xff] %v1976_v34   ;;  %v1428_v47 = vmul.f32 %v1411_v52, %v2597_v56 }
 0x2e7   : > { %v1415_v43 = vmul.f32 0.5, %v1414_v44 }
 0x2e8   : > { %v1439_v51 = vmul.f32 %v2616_v27, %v1428_v47 }
 0x2e9   : > { %v1416_v46 = vsub.f32 1.5, %v1415_v43 }
 0x2ea   : > { %v1450_v56 = vadd.f32 %v2619_v36, %v1439_v51 }
 0x2eb   : > { %v1417_v49 = vmul.f32 %v2103_v39, %v1416_v46 }
 0x2ed   : > { %v1421_v50 = vsel %vm1420_vm8, %v2103_v39, %v1417_v49 }
 0x2ee   : > { %v1429_v53 = vmul.f32 %v1421_v50, %v2602_v60 }
 0x2f0   : > { %v1440_v37 = vmul.f32 %v2616_v27, %v1429_v53 }
 0x2f2   : > { %v1451_v54 = vadd.f32 %v2619_v36, %v1440_v37 }
 0x2f4   : > { %v1981_v55 = vpack.c.bf16 %v1451_v54, %v1450_v56 }
 0x2f6   : > { %1985 = vst [vmem:[%s2629_s15 + $0x18] sm:$0xff] %v1981_v55  }
 0x2f7   : > { %2251 = shalt.err (!%p2248_p0)
}
 0x2f8   : > { %s2324_s18 = smov 64   ;;  %s2325_s11 = smov 4  }
 0x2f9   : > { %2000 = dma.vmem_to_hbm [thread:$0]  (%p2458_p3), %s1482_s17, 512, %s1484_s20, %s1469_s27, %s2324_s18, %s2324_s18, %s2325_s11  }
 0x2fa PF: > { %s1498_s16 = sand.u32 1, %s2294_s24   ;;  %p2017_p5 = pnand %p1606_p11, %p2415_p6 }
 0x2fb   : > { %s1499_s15 = scalar_lea.sflag [#allocation5], %s1498_s16 }
 0x2fc   : > { %p2018_p7 = pneg %p2017_p5 }
 0x2fe   : > { %2289 = dma.done.wait (%p2018_p7), %s1499_s15, 512  }
 0x2ff   : > { %2291 = vsyncadd (%p2018_p7), %s1499_s15, 4294966784  ;;  %s25_s29 = sadd.s32 1, %s2314_s29   ;;  %s2726_s22 = sld [smem:[#allocation17_spill]] }
 0x300   : > { %p22_p9 = scmp.ge.s32.totalorder %s25_s29, 4   ;;  %s2727_s24 = smov %s2298_s25 }
 0x301   : > { %s2728_s25 = smov %s2302_s26  ;;  %s2729_s26 = smov %s2474_s10 }
 0x302   : > { %s2730_s27 = smov %s2310_s28  ;;  %24 = sbr.rel (!%p22_p9) target bundleno = 12 (0xc), region = 116 }
 0x305   : > { %s2731_s28 = smov %s2726_s22 }
 0x307   :  { %1505 = vsyncpa [#allocation4], 1 }
 0x308   :  { %1507 = vsyncpa [#allocation4 + $0x1], 1 }
 0x309   :  { %1508 = vsyncpa [#allocation7], 1 }
 0x30a   :  { %1509 = vsyncpa [#allocation10], 1 }
 0x30b   :  { %1510 = vsyncpa [#allocation5], 1 }
 0x30c   :  { %1512 = vsyncpa [#allocation5 + $0x1], 1 }

</bundles_post_ra>
